<compile_context>
chip_gen: v7x
topology: tpu7x:2x2x1
jax: 0.10.0
libtpu: 0.0.40
codegen_flags: <defaults>
</compile_context>

<pallas_src>
import jax
import jax.numpy as jnp
from jax.experimental import pallas as pl
from jax.experimental.pallas import tpu as pltpu


def _round_up(x: int, m: int) -> int:
    return (x + m - 1) // m * m


def _prior_y_energy_kernel(scale_ref, y_ref, o_ref):
    # scale_ref: (1, 1) f32 in SMEM = 0.5 / y_scale**2
    # y_ref:     (TB, D) tile in VMEM
    # o_ref:     (TB, 1) f32 tile in VMEM
    y = y_ref[...].astype(jnp.float32)             # single upcast (hidden under HBM roofline)
    ssq = jnp.sum(y * y, axis=1, keepdims=True)    # XLU lane reduce -> (TB, 1)
    o_ref[...] = (scale_ref[0, 0] * ssq).astype(o_ref.dtype)


def prior_y_energy(y, y_scale, *, target_tile_bytes=4 * 1024 * 1024):
    """Pallas TPU implementation of PriorYEnergy.forward.

    y: (B, D) array. Returns (B,) f32: 0.5 * sum(y**2, axis=1) / y_scale**2.
    """
    B, D = y.shape
    dtype_bytes = jnp.dtype(y.dtype).itemsize

    # --- tile sizing ---------------------------------------------------------
    # VMEM footprint of one input tile: last dim is lane-padded to a multiple of
    # 128; rows must align to the dtype's sublane packing (8 for f32, 16 bf16).
    lanes = _round_up(max(D, 128), 128)
    row_align = max(8, 32 // dtype_bytes)
    rows_budget = max(row_align, target_tile_bytes // (lanes * dtype_bytes))
    tb = min(2048, rows_budget)                    # 512-2048 rows hits ~85% HBM roofline
    tb = min(tb, _round_up(B, row_align))          # don't over-pad tiny batches
    tb = max(row_align, (tb // row_align) * row_align)

    b_pad = _round_up(B, tb)
    num_tiles = b_pad // tb
    if b_pad != B:
        y = jnp.pad(y, ((0, b_pad - B), (0, 0)))   # zero rows -> zero energy, sliced off

    # Runtime scalar (no recompile when y_scale changes).
    half_inv_scale_sq = jnp.reshape(
        0.5 / (jnp.asarray(y_scale, dtype=jnp.float32) ** 2), (1, 1)
    ).astype(jnp.float32)

    cost = pl.CostEstimate(
        flops=2 * B * D,
        transcendentals=0,
        bytes_accessed=B * D * dtype_bytes + B * 4,
    )

    out = pl.pallas_call(
        _prior_y_energy_kernel,
        out_shape=jax.ShapeDtypeStruct((b_pad, 1), jnp.float32),
        grid=(num_tiles,),
        in_specs=[
            pl.BlockSpec(memory_space=pltpu.MemorySpace.SMEM),   # (1,1) scalar, whole array
            pl.BlockSpec((tb, D), lambda i: (i, 0)),             # batch tile (auto double-buffered)
        ],
        out_specs=pl.BlockSpec((tb, 1), lambda i: (i, 0)),
        compiler_params=pltpu.CompilerParams(
            dimension_semantics=("parallel",),                    # lets v7x shard tiles across both TCs
        ),
        cost_estimate=cost,
    )(half_inv_scale_sq, y)

    return out[:B, 0]


if __name__ == "__main__":
    # Module "parameter": y_scale set deterministically in-script.
    y_scale = 1.5

    # Small latent consistent with the module: batch=2, y_dim=32.
    key = jax.random.PRNGKey(0)
    B, D = 2, 32
    y = jax.random.normal(key, (B, D), dtype=jnp.float32)

    result = prior_y_energy(y, y_scale)
    jax.block_until_ready(result)

    ref = 0.5 * jnp.sum(y ** 2, axis=1) / (y_scale ** 2)
    assert result.shape == (B,)
    assert jnp.allclose(result, ref, rtol=1e-5, atol=1e-5)

    # Second check: exercises the multi-tile grid + batch padding path.
    B2 = 4100
    y2 = jax.random.normal(jax.random.PRNGKey(1), (B2, D), dtype=jnp.float32)
    result2 = prior_y_energy(y2, y_scale)
    jax.block_until_ready(result2)
    ref2 = 0.5 * jnp.sum(y2 ** 2, axis=1) / (y_scale ** 2)
    assert result2.shape == (B2,)
    assert jnp.allclose(result2, ref2, rtol=1e-5, atol=1e-5)

    print("KERNEL_OK")
</pallas_src>

<mosaic_0001>
module attributes {stable_mosaic.version = 11 : i64} {
  func.func @_prior_y_energy_kernel(%arg0: i32, %arg1: memref<1x1xf32, #tpu.memory_space<smem>>, %arg2: memref<8x32xf32, #tpu.memory_space<vmem>>, %arg3: memref<8x1xf32, #tpu.memory_space<vmem>>) attributes {dimension_semantics = [#tpu.dimension_semantics<parallel>], iteration_bounds = array<i64: 1>, scalar_prefetch = 0 : i64, scratch_operands = 0 : i64, tpu.core_type = #tpu.core_type<tc>, window_params = [{transform_indices = @transform_0, window_bounds = array<i64: 1, 1>}, {transform_indices = @transform_1, window_bounds = array<i64: 8, 32>}, {transform_indices = @transform_2, window_bounds = array<i64: 8, 1>}]} {
    %c0 = arith.constant 0 : index
    %c0_0 = arith.constant 0 : index
    %0 = vector.load %arg2[%c0, %c0_0] : memref<8x32xf32, #tpu.memory_space<vmem>>, vector<8x32xf32>
    %1 = arith.mulf %0, %0 : vector<8x32xf32>
    %cst = arith.constant dense<0.000000e+00> : vector<8xf32>
    %2 = vector.multi_reduction <add>, %1, %cst [1] : vector<8x32xf32> to vector<8xf32>
    %3 = vector.shape_cast %2 : vector<8xf32> to vector<8x1xf32>
    %c0_1 = arith.constant 0 : index
    %c0_2 = arith.constant 0 : index
    %4 = memref.load %arg1[%c0_1, %c0_2] : memref<1x1xf32, #tpu.memory_space<smem>>
    %5 = vector.broadcast %4 : f32 to vector<8x1xf32>
    %6 = arith.mulf %5, %3 : vector<8x1xf32>
    %c0_3 = arith.constant 0 : index
    %c0_4 = arith.constant 0 : index
    %7 = vector.load %arg3[%c0_3, %c0_4] : memref<8x1xf32, #tpu.memory_space<vmem>>, vector<8x1xf32>
    tpu.vector_store %arg3[%c0_3, %c0_4], %6 {strides = array<i32>} : memref<8x1xf32, #tpu.memory_space<vmem>>, vector<8x1xf32>,
    return
  }
  func.func @transform_0(%arg0: i32) -> (i32, i32) {
    %c0_i32 = arith.constant 0 : i32
    %c0_i32_0 = arith.constant 0 : i32
    %c0_i32_1 = arith.constant 0 : i32
    return %c0_i32, %c0_i32_0 : i32, i32
  }
  func.func @transform_1(%arg0: i32) -> (i32, i32) {
    %c0_i32 = arith.constant 0 : i32
    %c0_i32_0 = arith.constant 0 : i32
    return %arg0, %c0_i32 : i32, i32
  }
  func.func @transform_2(%arg0: i32) -> (i32, i32) {
    %c0_i32 = arith.constant 0 : i32
    %c0_i32_0 = arith.constant 0 : i32
    return %arg0, %c0_i32 : i32, i32
  }
}

</mosaic_0001>

<bundles_post_ra>
// kernel: tpu_custom_call.1
= control target key start
LH: loop header
LB: loop body
LE: loop exit
PB: predicated region body
PF: predicated region fallthrough
CT: control target
= control target key end

     0   :  { %8 = vsyncpa [#allocation4], 0  ;;  %s65_s9 = smov [#allocation3]   ;;  %s99_s0 = inlined_call_operand.<no memory space> [shape: f32[1,1], index: 0, kind: input, shape index: {}]   ;;  %s100_s1 = inlined_call_operand.hbm [shape: f32[8,32], index: 1, kind: input, shape index: {}]   ;;  %s101_s2 = inlined_call_operand.vmem [shape: f32[8,1], index: 2, kind: output, shape index: {}]  }
   0x1   :  { %s17_s10 = sshll.u32 %s65_s9, 4  ;;  %s41_s13 = scalar_lea.hbm %s100_s1, 128  ;;  %s18_s10 = int_to_ptr.vmem [resolvable:$true] %s17_s10 }
   0x2   :  { %p42_p0 = scmp.ne.s32.totalorder %s100_s1, %s41_s13  ;;  %p45_p1 = scmp.lt.u32.totalorder %s41_s13, %s100_s1 }
   0x4   :  { %p47_p2 = pnand %p45_p1, %p42_p0 }
   0x6   :  { %50 = shalt.err (!%p47_p2)
}
   0x7   :  { %s51_s18 = scalar_lea.vmem %s18_s10, 128  ;;  %p56_p4 = scmp.lt.s32.totalorder %s18_s10, %s18_s10 }
   0x8   :  { %p52_p3 = scmp.ne.s32.totalorder %s18_s10, %s51_s18  ;;  %p57_p5 = scmp.lt.s32.totalorder %s51_s18, %s51_s18 }
   0xa   :  { %p58_p6 = por %p57_p5, %p56_p4 }
   0xc   :  { %p59_p7 = pnand %p58_p6, %p52_p3 }
   0xe   :  { %62 = shalt.err (!%p59_p7)
}
   0xf   :  { %20 = dma.hbm_to_vmem [thread:$0]  %s100_s1, 128, %s18_s10, [#allocation4]  }
  0x10   :  { %63 = dma.done.wait [#allocation4], 128  }
  0x11   :  { %64 = vsyncadd [#allocation4], 4294967168  ;;  %v24_v0 = vld [vmem:[#allocation3] sm:$0xff]  ;;  %vm26_vm0 = vcmask 261120   ;;  %v31_v3 = vstv %s99_s0  ;;  %vm33_vm1 = vcmask 7168  }
  0x12   :  { %v25_v1 = vmul.f32 %v24_v0, %v24_v0 }
  0x14   :  { %v27_v2 = vsel %vm26_vm0, %v25_v1, 0.0 }
  0x15   :  { %28 = vadd.xlane.f32.xlu0 %v27_v2 }
  0xa2   :  { %v29_v4 = vpop.xlane.xlu0 %28 }
  0xa3   :  { %v32_v5 = vmul.f32 %v31_v3, %v29_v4 }
  0xa5   :  { %34 = vst.msk [vmem:[%s101_s2] sm:$0xff] %vm33_vm1, %v32_v5 }
  0xa6   :  { %39 = vsyncpa [#allocation4], 1 }

</bundles_post_ra>
